<compile_context>
chip_gen: v6e
topology: v6e:2x2x1
jax: 0.10.0
libtpu: 0.0.40
codegen_flags: <defaults>
</compile_context>

<pallas_src>
import functools

import jax
import jax.numpy as jnp
from jax.experimental import pallas as pl
from jax.experimental.pallas import tpu as pltpu


def _round_up(x: int, m: int) -> int:
    return ((x + m - 1) // m) * m


def _apply_activation(x, activation: str):
    if activation == "identity":
        return x
    if activation == "silu":
        return x * jax.nn.sigmoid(x)
    raise ValueError(f"unknown activation {activation}")


def _residual_kernel(x_ref, w1_ref, b1_ref, w2_ref, b2_ref, o_ref,
                     *, activation: str):
    """Fused Residual block: two Dense layers (activation_first) + skip add."""
    compute_dtype = w1_ref.dtype  # MXU operand dtype (bf16 in production)

    x = x_ref[...]

    # mlp1: activation first, then linear (x @ W1.T == x @ w1t, w1t = [in,out])
    if activation == "identity":
        h = x.astype(compute_dtype)
    else:
        h = _apply_activation(x.astype(jnp.float32),
                              activation).astype(compute_dtype)
    h = jnp.dot(h, w1_ref[...], preferred_element_type=jnp.float32)
    h = h + b1_ref[...].astype(jnp.float32)

    # mlp2: activation first, then linear
    if activation != "identity":
        h = _apply_activation(h, activation)
    h = jnp.dot(h.astype(compute_dtype), w2_ref[...],
                preferred_element_type=jnp.float32)
    h = h + b2_ref[...].astype(jnp.float32)

    # residual add in f32, cast to output dtype
    o_ref[...] = (x.astype(jnp.float32) + h).astype(o_ref.dtype)


def residual_forward(x, w1, b1, w2, b2, *,
                     activation: str = "identity",
                     compute_dtype=jnp.bfloat16,
                     tile_n: int = 1024):
    """x: [N, H]; w1, w2: [H, H] PyTorch-style [out, in]; b1, b2: [H]."""
    n, hdim = x.shape
    assert w1.shape == (hdim, hdim) and w2.shape == (hdim, hdim)
    assert b1.shape == (hdim,) and b2.shape == (hdim,)
    compute_dtype = jnp.dtype(compute_dtype)

    # One-time HBM-side prep: transpose to [in, out] (so the kernel uses a
    # plain contraction, no per-step weight transpose) and cast to MXU dtype.
    w1t = w1.T.astype(compute_dtype)
    w2t = w2.T.astype(compute_dtype)
    b1r = b1.astype(jnp.float32).reshape(1, hdim)
    b2r = b2.astype(jnp.float32).reshape(1, hdim)

    # ---- row-tile selection ----------------------------------------------
    tile_n = max(16, _round_up(min(tile_n, n), 16))
    if n > 16:
        # Keep at least 2 grid steps so v7x's two TensorCores both get work.
        tile_n = min(tile_n, _round_up(pl.cdiv(n, 2), 16))

    # ---- VMEM budgeting ----------------------------------------------------
    h_lane = _round_up(hdim, 128)           # VMEM lane padding
    x_bytes = jnp.dtype(x.dtype).itemsize
    w_bytes = compute_dtype.itemsize

    def vmem_estimate(tn: int) -> int:
        w = 2 * _round_up(hdim, 8) * h_lane * w_bytes * 2   # W1, W2 (worst case dbl-buf)
        b = 2 * 8 * h_lane * 4 * 2                          # biases
        io = 2 * tn * h_lane * (x_bytes + x_bytes)          # x tile + out tile, dbl-buf
        return w + b + io

    budget = 40 * 1024 * 1024
    while tile_n > 16 and vmem_estimate(tile_n) > budget:
        tile_n = max(16, _round_up(tile_n // 2, 16))
    # TODO(synk): add a K/N-tiled weight path (extra grid axis) once
    # 2*H^2*bytes alone exceeds ~24 MiB (needed for very large hidden on v7x).

    vmem_limit = min(56 * 1024 * 1024,
                     max(32 * 1024 * 1024, vmem_estimate(tile_n) + 16 * 1024 * 1024))

    grid = (pl.cdiv(n, tile_n),)
    kernel = functools.partial(_residual_kernel, activation=activation)

    cost = pl.CostEstimate(
        flops=4 * n * hdim * hdim,  # two N x H x H matmuls
        transcendentals=(0 if activation == "identity" else 2 * n * hdim),
        bytes_accessed=(2 * n * hdim * x_bytes          # x read + out write
                        + 2 * hdim * hdim * w_bytes     # W1, W2
                        + 2 * hdim * 4),                # biases
    )

    def build(single_buffer_weights: bool):
        def resident(shape):
            kw = {}
            if single_buffer_weights:
                # Constant index_map -> double-buffering is pure VMEM waste.
                kw["pipeline_mode"] = pl.Buffered(1)
            return pl.BlockSpec(shape, lambda i: (0, 0), **kw)

        return pl.pallas_call(
            kernel,
            out_shape=jax.ShapeDtypeStruct((n, hdim), x.dtype),
            grid=grid,
            in_specs=[
                pl.BlockSpec((tile_n, hdim), lambda i: (i, 0)),  # x: row-tiled
                resident((hdim, hdim)),                          # W1^T: resident
                resident((1, hdim)),                             # b1:   resident
                resident((hdim, hdim)),                          # W2^T: resident
                resident((1, hdim)),                             # b2:   resident
            ],
            out_specs=pl.BlockSpec((tile_n, hdim), lambda i: (i, 0)),
            compiler_params=pltpu.CompilerParams(
                dimension_semantics=("parallel",),
                vmem_limit_bytes=vmem_limit,
            ),
            cost_estimate=cost,
        )

    args = (x, w1t, b1r, w2t, b2r)
    try:
        return build(True)(*args)
    except Exception:
        # pl.Buffered(1) not supported on this jax build -> default buffering.
        return build(False)(*args)


def he_orthogonal_init(key, hidden_dim, dtype=jnp.float32):
    """Square orthogonal matrix scaled He-style (test-only weight init)."""
    a = jax.random.normal(key, (hidden_dim, hidden_dim), jnp.float32)
    q, _ = jnp.linalg.qr(a)
    return (q * jnp.sqrt(2.0 / hidden_dim)).astype(dtype)


def _reference(x, w1, b1, w2, b2, activation="identity"):
    def act(v):
        return v if activation == "identity" else v * jax.nn.sigmoid(v)
    y = act(x) @ w1.T + b1
    y = act(y) @ w2.T + b2
    return x + y


if __name__ == "__main__":
    key = jax.random.PRNGKey(0)
    k1, k2, k3, k4, k5, k6, k7 = jax.random.split(key, 7)

    # Case 1: module-natural small shape (hidden=32, 8 rows). Full-extent lane
    # blocks (h < 128), single grid step, f32 MXU path, tight tolerance.
    hidden, n_rows = 32, 8
    x = jax.random.normal(k1, (n_rows, hidden), jnp.float32)
    w1 = he_orthogonal_init(k2, hidden)
    w2 = he_orthogonal_init(k3, hidden)
    b1 = 0.1 * jax.random.normal(k6, (hidden,), jnp.float32)
    b2 = 0.1 * jax.random.normal(k7, (hidden,), jnp.float32)

    out = jax.block_until_ready(
        residual_forward(x, w1, b1, w2, b2, compute_dtype=jnp.float32))
    ref = _reference(x, w1, b1, w2, b2)
    assert jnp.allclose(out, ref, atol=1e-5, rtol=1e-5), "case1 mismatch"

    # Case 1b: silu activation (activation_first), f32.
    out1b = jax.block_until_ready(
        residual_forward(x, w1, b1, w2, b2, activation="silu",
                         compute_dtype=jnp.float32))
    ref1b = _reference(x, w1, b1, w2, b2, activation="silu")
    assert jnp.allclose(out1b, ref1b, atol=1e-5, rtol=1e-5), "case1b mismatch"

    # Case 2: hidden=128, ragged row count (272) -> 2-step row grid with a
    # masked tail tile (no wrapper pad/slice), bf16 MXU operands.
    hidden2, n_rows2 = 128, 272
    x2 = jax.random.normal(k4, (n_rows2, hidden2), jnp.float32)
    w1_2 = he_orthogonal_init(k5, hidden2)
    w2_2 = he_orthogonal_init(k2, hidden2)
    b1_2 = 0.1 * jax.random.normal(k6, (hidden2,), jnp.float32)
    b2_2 = 0.1 * jax.random.normal(k7, (hidden2,), jnp.float32)

    out2 = jax.block_until_ready(
        residual_forward(x2, w1_2, b1_2, w2_2, b2_2))
    ref2 = _reference(x2, w1_2, b1_2, w2_2, b2_2)
    assert jnp.allclose(out2, ref2, atol=3e-2, rtol=3e-2), "case2 mismatch"

    print("KERNEL_OK")
</pallas_src>

<mosaic_0001>
module attributes {stable_mosaic.version = 11 : i64} {
  func.func @_residual_kernel(%arg0: i32, %arg1: memref<16x32xf32, #tpu.memory_space<vmem>>, %arg2: memref<32x32xf32, #tpu.memory_space<vmem>>, %arg3: memref<1x32xf32, #tpu.memory_space<vmem>>, %arg4: memref<32x32xf32, #tpu.memory_space<vmem>>, %arg5: memref<1x32xf32, #tpu.memory_space<vmem>>, %arg6: memref<16x32xf32, #tpu.memory_space<vmem>>) attributes {dimension_semantics = [#tpu.dimension_semantics<parallel>], iteration_bounds = array<i64: 1>, scalar_prefetch = 0 : i64, scratch_operands = 0 : i64, tpu.core_type = #tpu.core_type<tc>, window_params = [{transform_indices = @transform_0, window_bounds = array<i64: 16, 32>}, {pipeline_mode = #tpu.pipeline_mode<synchronous>, transform_indices = @transform_1, window_bounds = array<i64: 32, 32>}, {pipeline_mode = #tpu.pipeline_mode<synchronous>, transform_indices = @transform_2, window_bounds = array<i64: 1, 32>}, {pipeline_mode = #tpu.pipeline_mode<synchronous>, transform_indices = @transform_3, window_bounds = array<i64: 32, 32>}, {pipeline_mode = #tpu.pipeline_mode<synchronous>, transform_indices = @transform_4, window_bounds = array<i64: 1, 32>}, {transform_indices = @transform_5, window_bounds = array<i64: 16, 32>}]} {
    %c0 = arith.constant 0 : index
    %c0_0 = arith.constant 0 : index
    %0 = vector.load %arg1[%c0, %c0_0] : memref<16x32xf32, #tpu.memory_space<vmem>>, vector<16x32xf32>
    %c0_1 = arith.constant 0 : index
    %c0_2 = arith.constant 0 : index
    %1 = vector.load %arg2[%c0_1, %c0_2] : memref<32x32xf32, #tpu.memory_space<vmem>>, vector<32x32xf32>
    %cst = arith.constant dense<0.000000e+00> : vector<16x32xf32>
    %2 = tpu.matmul %0, %1, %cst {dimension_numbers = #tpu.dot_dimension_numbers<[1], [0], [0], [1], [0, 0, 1, 1], [], []>} : vector<16x32xf32>, vector<32x32xf32>, vector<16x32xf32> -> vector<16x32xf32>
    %c0_3 = arith.constant 0 : index
    %c0_4 = arith.constant 0 : index
    %3 = vector.load %arg3[%c0_3, %c0_4] : memref<1x32xf32, #tpu.memory_space<vmem>>, vector<1x32xf32>
    %4 = vector.broadcast %3 : vector<1x32xf32> to vector<16x32xf32>
    %5 = arith.addf %2, %4 : vector<16x32xf32>
    %c0_5 = arith.constant 0 : index
    %c0_6 = arith.constant 0 : index
    %6 = vector.load %arg4[%c0_5, %c0_6] : memref<32x32xf32, #tpu.memory_space<vmem>>, vector<32x32xf32>
    %cst_7 = arith.constant dense<0.000000e+00> : vector<16x32xf32>
    %7 = tpu.matmul %5, %6, %cst_7 {dimension_numbers = #tpu.dot_dimension_numbers<[1], [0], [0], [1], [0, 0, 1, 1], [], []>} : vector<16x32xf32>, vector<32x32xf32>, vector<16x32xf32> -> vector<16x32xf32>
    %c0_8 = arith.constant 0 : index
    %c0_9 = arith.constant 0 : index
    %8 = vector.load %arg5[%c0_8, %c0_9] : memref<1x32xf32, #tpu.memory_space<vmem>>, vector<1x32xf32>
    %9 = vector.broadcast %8 : vector<1x32xf32> to vector<16x32xf32>
    %10 = arith.addf %7, %9 : vector<16x32xf32>
    %11 = arith.addf %0, %10 : vector<16x32xf32>
    %c0_10 = arith.constant 0 : index
    %c0_11 = arith.constant 0 : index
    %12 = vector.load %arg6[%c0_10, %c0_11] : memref<16x32xf32, #tpu.memory_space<vmem>>, vector<16x32xf32>
    tpu.vector_store %arg6[%c0_10, %c0_11], %11 {strides = array<i32>} : memref<16x32xf32, #tpu.memory_space<vmem>>, vector<16x32xf32>,
    return
  }
  func.func @transform_0(%arg0: i32) -> (i32, i32) {
    %c0_i32 = arith.constant 0 : i32
    %c0_i32_0 = arith.constant 0 : i32
    return %arg0, %c0_i32 : i32, i32
  }
  func.func @transform_1(%arg0: i32) -> (i32, i32) {
    %c0_i32 = arith.constant 0 : i32
    %c0_i32_0 = arith.constant 0 : i32
    %c0_i32_1 = arith.constant 0 : i32
    return %c0_i32, %c0_i32_0 : i32, i32
  }
  func.func @transform_2(%arg0: i32) -> (i32, i32) {
    %c0_i32 = arith.constant 0 : i32
    %c0_i32_0 = arith.constant 0 : i32
    %c0_i32_1 = arith.constant 0 : i32
    return %c0_i32, %c0_i32_0 : i32, i32
  }
  func.func @transform_3(%arg0: i32) -> (i32, i32) {
    %c0_i32 = arith.constant 0 : i32
    %c0_i32_0 = arith.constant 0 : i32
    %c0_i32_1 = arith.constant 0 : i32
    return %c0_i32, %c0_i32_0 : i32, i32
  }
  func.func @transform_4(%arg0: i32) -> (i32, i32) {
    %c0_i32 = arith.constant 0 : i32
    %c0_i32_0 = arith.constant 0 : i32
    %c0_i32_1 = arith.constant 0 : i32
    return %c0_i32, %c0_i32_0 : i32, i32
  }
  func.func @transform_5(%arg0: i32) -> (i32, i32) {
    %c0_i32 = arith.constant 0 : i32
    %c0_i32_0 = arith.constant 0 : i32
    return %arg0, %c0_i32 : i32, i32
  }
}

module attributes {stable_mosaic.version = 11 : i64} {
  func.func @_residual_kernel(%arg0: i32, %arg1: memref<16x32xf32, #tpu.memory_space<vmem>>, %arg2: memref<32x32xf32, #tpu.memory_space<vmem>>, %arg3: memref<1x32xf32, #tpu.memory_space<vmem>>, %arg4: memref<32x32xf32, #tpu.memory_space<vmem>>, %arg5: memref<1x32xf32, #tpu.memory_space<vmem>>, %arg6: memref<16x32xf32, #tpu.memory_space<vmem>>) attributes {dimension_semantics = [#tpu.dimension_semantics<parallel>], iteration_bounds = array<i64: 1>, scalar_prefetch = 0 : i64, scratch_operands = 0 : i64, tpu.core_type = #tpu.core_type<tc>, window_params = [{transform_indices = @transform_0, window_bounds = array<i64: 16, 32>}, {pipeline_mode = #tpu.pipeline_mode<synchronous>, transform_indices = @transform_1, window_bounds = array<i64: 32, 32>}, {pipeline_mode = #tpu.pipeline_mode<synchronous>, transform_indices = @transform_2, window_bounds = array<i64: 1, 32>}, {pipeline_mode = #tpu.pipeline_mode<synchronous>, transform_indices = @transform_3, window_bounds = array<i64: 32, 32>}, {pipeline_mode = #tpu.pipeline_mode<synchronous>, transform_indices = @transform_4, window_bounds = array<i64: 1, 32>}, {transform_indices = @transform_5, window_bounds = array<i64: 16, 32>}]} {
    %c0 = arith.constant 0 : index
    %c0_0 = arith.constant 0 : index
    %0 = vector.load %arg1[%c0, %c0_0] : memref<16x32xf32, #tpu.memory_space<vmem>>, vector<16x32xf32>
    %c0_1 = arith.constant 0 : index
    %c0_2 = arith.constant 0 : index
    %1 = vector.load %arg2[%c0_1, %c0_2] : memref<32x32xf32, #tpu.memory_space<vmem>>, vector<32x32xf32>
    %cst = arith.constant dense<0.000000e+00> : vector<16x32xf32>
    %2 = tpu.matmul %0, %1, %cst {dimension_numbers = #tpu.dot_dimension_numbers<[1], [0], [0], [1], [0, 0, 1, 1], [], []>} : vector<16x32xf32>, vector<32x32xf32>, vector<16x32xf32> -> vector<16x32xf32>
    %c0_3 = arith.constant 0 : index
    %c0_4 = arith.constant 0 : index
    %3 = vector.load %arg3[%c0_3, %c0_4] : memref<1x32xf32, #tpu.memory_space<vmem>>, vector<1x32xf32>
    %4 = vector.broadcast %3 : vector<1x32xf32> to vector<16x32xf32>
    %5 = arith.addf %2, %4 : vector<16x32xf32>
    %c0_5 = arith.constant 0 : index
    %c0_6 = arith.constant 0 : index
    %6 = vector.load %arg4[%c0_5, %c0_6] : memref<32x32xf32, #tpu.memory_space<vmem>>, vector<32x32xf32>
    %cst_7 = arith.constant dense<0.000000e+00> : vector<16x32xf32>
    %7 = tpu.matmul %5, %6, %cst_7 {dimension_numbers = #tpu.dot_dimension_numbers<[1], [0], [0], [1], [0, 0, 1, 1], [], []>} : vector<16x32xf32>, vector<32x32xf32>, vector<16x32xf32> -> vector<16x32xf32>
    %c0_8 = arith.constant 0 : index
    %c0_9 = arith.constant 0 : index
    %8 = vector.load %arg5[%c0_8, %c0_9] : memref<1x32xf32, #tpu.memory_space<vmem>>, vector<1x32xf32>
    %9 = vector.broadcast %8 : vector<1x32xf32> to vector<16x32xf32>
    %10 = arith.addf %7, %9 : vector<16x32xf32>
    %11 = arith.addf %0, %10 : vector<16x32xf32>
    %c0_10 = arith.constant 0 : index
    %c0_11 = arith.constant 0 : index
    %12 = vector.load %arg6[%c0_10, %c0_11] : memref<16x32xf32, #tpu.memory_space<vmem>>, vector<16x32xf32>
    tpu.vector_store %arg6[%c0_10, %c0_11], %11 {strides = array<i32>} : memref<16x32xf32, #tpu.memory_space<vmem>>, vector<16x32xf32>,
    return
  }
  func.func @transform_0(%arg0: i32) -> (i32, i32) {
    %c0_i32 = arith.constant 0 : i32
    %c0_i32_0 = arith.constant 0 : i32
    return %arg0, %c0_i32 : i32, i32
  }
  func.func @transform_1(%arg0: i32) -> (i32, i32) {
    %c0_i32 = arith.constant 0 : i32
    %c0_i32_0 = arith.constant 0 : i32
    %c0_i32_1 = arith.constant 0 : i32
    return %c0_i32, %c0_i32_0 : i32, i32
  }
  func.func @transform_2(%arg0: i32) -> (i32, i32) {
    %c0_i32 = arith.constant 0 : i32
    %c0_i32_0 = arith.constant 0 : i32
    %c0_i32_1 = arith.constant 0 : i32
    return %c0_i32, %c0_i32_0 : i32, i32
  }
  func.func @transform_3(%arg0: i32) -> (i32, i32) {
    %c0_i32 = arith.constant 0 : i32
    %c0_i32_0 = arith.constant 0 : i32
    %c0_i32_1 = arith.constant 0 : i32
    return %c0_i32, %c0_i32_0 : i32, i32
  }
  func.func @transform_4(%arg0: i32) -> (i32, i32) {
    %c0_i32 = arith.constant 0 : i32
    %c0_i32_0 = arith.constant 0 : i32
    %c0_i32_1 = arith.constant 0 : i32
    return %c0_i32, %c0_i32_0 : i32, i32
  }
  func.func @transform_5(%arg0: i32) -> (i32, i32) {
    %c0_i32 = arith.constant 0 : i32
    %c0_i32_0 = arith.constant 0 : i32
    return %arg0, %c0_i32 : i32, i32
  }
}

</mosaic_0001>

<bundles_post_ra>
// kernel: tpu_custom_call.1
= control target key start
LH: loop header
LB: loop body
LE: loop exit
PB: predicated region body
PF: predicated region fallthrough
CT: control target
= control target key end

     0   :  { %10 = vsyncpa [#allocation3], 0  ;;  %s475_s0 = inlined_call_operand.hbm [shape: f32[8,32], index: 0, kind: input, shape index: {}]   ;;  %s476_s1 = inlined_call_operand.hbm [shape: f32[32,32], index: 1, kind: input, shape index: {}]   ;;  %s477_s2 = inlined_call_operand.vmem [shape: f32[1,32], index: 2, kind: input, shape index: {}]   ;;  %s478_s3 = inlined_call_operand.hbm [shape: f32[32,32], index: 3, kind: input, shape index: {}]   ;;  %s479_s4 = inlined_call_operand.vmem [shape: f32[1,32], index: 4, kind: input, shape index: {}]   ;;  %s480_s5 = inlined_call_operand.hbm [shape: f32[8,32], index: 5, kind: output, shape index: {}]  }
   0x1   :  { %11 = vsyncpa [#allocation6], 0 }
   0x2   :  { %12 = vsyncpa [#allocation4], 0 }
   0x3   :  { %17 = vsyncadd [#allocation3], 128  ;;  %s403_s18 = smov [#allocation5]   ;;  %s404_s20 = smov [#allocation2]  }
   0x4   :  { %s30_s19 = sshll.u32 %s403_s18, 4  ;;  %s18_s21 = sshll.u32 %s404_s20, 4  ;;  %s31_s19 = int_to_ptr.vmem [resolvable:$true] %s30_s19  ;;  %s19_s21 = int_to_ptr.vmem [resolvable:$true] %s18_s21 }
   0x5   :  { %s325_s22 = scalar_lea.vmem %s31_s19, 512  ;;  %p330_p1 = scmp.lt.s32.totalorder %s31_s19, %s31_s19 }
   0x6   :  { %p326_p0 = scmp.ne.s32.totalorder %s31_s19, %s325_s22  ;;  %p331_p2 = scmp.lt.s32.totalorder %s325_s22, %s325_s22 }
   0x8   :  { %p332_p3 = por %p331_p2, %p330_p1 }
   0xa   :  { %p333_p4 = pnand %p332_p3, %p326_p0 }
   0xc   :  { %336 = shalt.err (!%p333_p4)
}
   0xd   :  { %s405_s23 = smov 128   ;;  %s406_s24 = smov 8  }
   0xe   :  { %36 = dma.hbm_to_vmem [thread:$0]  %s476_s1, 512, %s31_s19, [#allocation6], %s405_s23, %s405_s23, %s406_s24  }
   0xf   :  { %s345_s27 = scalar_lea.vmem %s19_s21, 128  ;;  %s349_s28 = scalar_lea.vmem %s19_s21, 256 }
  0x10   :  { %p346_p5 = scmp.ne.s32.totalorder %s19_s21, %s345_s27  ;;  %p350_p6 = scmp.lt.s32.totalorder %s19_s21, %s19_s21 }
  0x11   :  { %p351_p7 = scmp.lt.s32.totalorder %s349_s28, %s345_s27 }
  0x13   :  { %p352_p8 = por %p351_p7, %p350_p6 }
  0x15   :  { %p353_p9 = pnand %p352_p8, %p346_p5 }
  0x17   :  { %356 = shalt.err (!%p353_p9)
}
  0x18   :  { %24 = dma.hbm_to_vmem [thread:$0]  %s475_s0, 128, %s19_s21, [#allocation3], %s405_s23, %s405_s23, %s406_s24  }
  0x19   :  { %s407_s6 = smov [#allocation7]  }
  0x1a   :  { %s44_s7 = sshll.u32 %s407_s6, 4  ;;  %s45_s7 = int_to_ptr.vmem [resolvable:$true] %s44_s7 }
  0x1b   :  { %s365_s8 = scalar_lea.vmem %s45_s7, 512  ;;  %p370_p11 = scmp.lt.s32.totalorder %s45_s7, %s45_s7 }
  0x1c   :  { %p366_p10 = scmp.ne.s32.totalorder %s45_s7, %s365_s8  ;;  %p371_p12 = scmp.lt.s32.totalorder %s365_s8, %s365_s8 }
  0x1e   :  { %p372_p13 = por %p371_p12, %p370_p11 }
  0x20   :  { %p373_p0 = pnand %p372_p13, %p366_p10 }
  0x22   :  { %376 = shalt.err (!%p373_p0)
}
  0x23   :  { %50 = dma.hbm_to_vmem [thread:$0]  %s478_s3, 512, %s45_s7, [#allocation6], %s405_s23, %s405_s23, %s406_s24  }
  0x24   :  { %397 = dma.done.wait [#allocation3], 256  }
  0x25   :  { %398 = vsyncadd [#allocation3], 4294967040 }
  0x26   :  { %399 = dma.done.wait [#allocation6], 1024  }
  0x27   :  { %400 = vsyncadd [#allocation6], 4294966272  ;;  %vm75_vm0 = vcmask 261120   ;;  %v67_v0 = vld [vmem:[#allocation5 + $0x18] sm:$0xff]  ;;  %v66_v1 = vld [vmem:[#allocation5 + $0x10] sm:$0xff] }
  0x28   :  { %289 = vmatprep.subr.mxu0 %v67_v0  ;;  %v62_v2 = vld [vmem:[#allocation2] sm:$0xff]  ;;  %v65_v3 = vld [vmem:[#allocation5 + $0x8] sm:$0xff]  ;;  %v160_v4 = vld [vmem:[#allocation7 + $0x18] sm:$0xff] }
  0x29   :  { %290 = vmatpush3.msra.mxu0 %v67_v0  ;;  %297 = vmatprep.mubr.msk.f32.mxu0 %vm75_vm0, %v62_v2  ;;  %v64_v5 = vld [vmem:[#allocation5] sm:$0xff]  ;;  %v63_v6 = vld [vmem:[#allocation2 + $0x8] sm:$0xff]  ;;  %v159_v7 = vld [vmem:[#allocation7 + $0x10] sm:$0xff] }
  0x2a   :  { %291 = vmatprep.subr.mxu0 %v66_v1  ;;  %300 = vmatprep.subr.mxu1 %v160_v4  ;;  %v158_v8 = vld [vmem:[#allocation7 + $0x8] sm:$0xff]  ;;  %v157_v9 = vld [vmem:[#allocation7] sm:$0xff]  ;;  %v271_v11 = vld [vmem:[%s477_s2] ss:$0 sm:$0xff] }
  0x2b   :  { %292 = vmatpush3.msra.mxu0 %v66_v1  ;;  %301 = vmatpush3.msra.mxu1 %v160_v4  ;;  %v274_v15 = vld [vmem:[%s479_s4] ss:$0 sm:$0xff] }
  0x2c   :  { %293 = vmatprep.subr.mxu0 %v65_v3  ;;  %302 = vmatprep.subr.mxu1 %v159_v7 }
  0x2d   :  { %294 = vmatpush3.msra.mxu0 %v65_v3  ;;  %303 = vmatpush3.msra.mxu1 %v159_v7 }
  0x2e   :  { %295 = vmatprep.subr.mxu0 %v64_v5  ;;  %304 = vmatprep.subr.mxu1 %v158_v8 }
  0x2f   :  { %296 = vmatpush3.msra.mxu0 %v64_v5  ;;  %305 = vmatpush3.msra.mxu1 %v158_v8 }
  0x30   :  { %298 = vmatmul.mubr.msk.f32.vlgmr.msra.gmra.mxu0 %vm75_vm0, %v63_v6  ;;  %306 = vmatprep.subr.mxu1 %v157_v9 }
  0x31   :  { %307 = vmatpush3.msra.mxu1 %v157_v9 }
  0xf0   :  { %v299_v10 = vpop.f32.mrf.mxu0 }
  0xf1   :  { %v154_v14 = vadd.f32 %v299_v10, %v271_v11 }
  0xf2   :  { %v148_v12 = vpop.f32.mrf.mxu0 }
  0xf3   :  { %v149_v13 = vadd.f32 %v271_v11, %v148_v12 }
  0xf5   :  { %308 = vmatprep.mubr.msk.f32.mxu1 %vm75_vm0, %v149_v13 }
  0xf6   :  { %309 = vmatmul.mubr.msk.f32.vlgmr.msra.gmra.mxu1 %vm75_vm0, %v154_v14 }
 0x1b6   :  { %v310_v16 = vpop.f32.mrf.mxu1 }
 0x1b7   :  { %v246_v17 = vadd.f32 %v310_v16, %v274_v15 }
 0x1b8   :  { %v240_v18 = vpop.f32.mrf.mxu1 }
 0x1b9   :  { %v250_v19 = vadd.f32 %v246_v17, %v63_v6  ;;  %v241_v20 = vadd.f32 %v274_v15, %v240_v18 }
 0x1bb   :  { %252 = vst.msk [vmem:[#allocation8 + $0x8] sm:$0xff] %vm75_vm0, %v250_v19  ;;  %v249_v21 = vadd.f32 %v241_v20, %v62_v2 }
 0x1bd   :  { %251 = vst.msk [vmem:[#allocation8] sm:$0xff] %vm75_vm0, %v249_v21 }
 0x1be   :  { %257 = vsyncadd [#allocation4], 128  ;;  %s408_s2 = smov [#allocation8]  }
 0x1bf   :  { %s258_s12 = sshll.u32 %s408_s2, 4  ;;  %s259_s12 = int_to_ptr.vmem [resolvable:$true] %s258_s12 }
 0x1c0   :  { %s377_s13 = scalar_lea.vmem %s259_s12, 128  ;;  %s381_s14 = scalar_lea.vmem %s259_s12, 256 }
 0x1c1   :  { %p378_p1 = scmp.ne.s32.totalorder %s259_s12, %s377_s13  ;;  %p382_p2 = scmp.lt.s32.totalorder %s259_s12, %s259_s12 }
 0x1c2   :  { %p383_p3 = scmp.lt.s32.totalorder %s381_s14, %s377_s13 }
 0x1c4   :  { %p384_p4 = por %p383_p3, %p382_p2 }
 0x1c6   :  { %p385_p5 = pnand %p384_p4, %p378_p1 }
 0x1c8   :  { %388 = shalt.err (!%p385_p5)
}
 0x1c9   :  { %264 = dma.vmem_to_hbm [thread:$0]  %s259_s12, 128, %s480_s5, [#allocation4], %s405_s23, %s405_s23, %s406_s24  }
 0x1ca   :  { %401 = dma.done.wait [#allocation4], 256  }
 0x1cb   :  { %402 = vsyncadd [#allocation4], 4294967040 }
 0x1cc   :  { %268 = vsyncpa [#allocation3], 1 }
 0x1cd   :  { %269 = vsyncpa [#allocation6], 1 }
 0x1ce   :  { %270 = vsyncpa [#allocation4], 1 }

// kernel: tpu_custom_call.1
= control target key start
LH: loop header
LB: loop body
LE: loop exit
PB: predicated region body
PF: predicated region fallthrough
CT: control target
= control target key end

     0   :  { %10 = vsyncpa [#allocation3], 0  ;;  %s475_s0 = inlined_call_operand.hbm [shape: f32[8,32], index: 0, kind: input, shape index: {}]   ;;  %s476_s1 = inlined_call_operand.hbm [shape: f32[32,32], index: 1, kind: input, shape index: {}]   ;;  %s477_s2 = inlined_call_operand.vmem [shape: f32[1,32], index: 2, kind: input, shape index: {}]   ;;  %s478_s3 = inlined_call_operand.hbm [shape: f32[32,32], index: 3, kind: input, shape index: {}]   ;;  %s479_s4 = inlined_call_operand.vmem [shape: f32[1,32], index: 4, kind: input, shape index: {}]   ;;  %s480_s5 = inlined_call_operand.hbm [shape: f32[8,32], index: 5, kind: output, shape index: {}]  }
   0x1   :  { %11 = vsyncpa [#allocation6], 0 }
   0x2   :  { %12 = vsyncpa [#allocation4], 0 }
   0x3   :  { %17 = vsyncadd [#allocation3], 128  ;;  %s403_s18 = smov [#allocation5]   ;;  %s404_s20 = smov [#allocation2]  }
   0x4   :  { %s30_s19 = sshll.u32 %s403_s18, 4  ;;  %s18_s21 = sshll.u32 %s404_s20, 4  ;;  %s31_s19 = int_to_ptr.vmem [resolvable:$true] %s30_s19  ;;  %s19_s21 = int_to_ptr.vmem [resolvable:$true] %s18_s21 }
   0x5   :  { %s325_s22 = scalar_lea.vmem %s31_s19, 512  ;;  %p330_p1 = scmp.lt.s32.totalorder %s31_s19, %s31_s19 }
   0x6   :  { %p326_p0 = scmp.ne.s32.totalorder %s31_s19, %s325_s22  ;;  %p331_p2 = scmp.lt.s32.totalorder %s325_s22, %s325_s22 }
   0x8   :  { %p332_p3 = por %p331_p2, %p330_p1 }
   0xa   :  { %p333_p4 = pnand %p332_p3, %p326_p0 }
   0xc   :  { %336 = shalt.err (!%p333_p4)
}
   0xd   :  { %s405_s23 = smov 128   ;;  %s406_s24 = smov 8  }
   0xe   :  { %36 = dma.hbm_to_vmem [thread:$0]  %s476_s1, 512, %s31_s19, [#allocation6], %s405_s23, %s405_s23, %s406_s24  }
   0xf   :  { %s345_s27 = scalar_lea.vmem %s19_s21, 128  ;;  %s349_s28 = scalar_lea.vmem %s19_s21, 256 }
  0x10   :  { %p346_p5 = scmp.ne.s32.totalorder %s19_s21, %s345_s27  ;;  %p350_p6 = scmp.lt.s32.totalorder %s19_s21, %s19_s21 }
  0x11   :  { %p351_p7 = scmp.lt.s32.totalorder %s349_s28, %s345_s27 }
  0x13   :  { %p352_p8 = por %p351_p7, %p350_p6 }
  0x15   :  { %p353_p9 = pnand %p352_p8, %p346_p5 }
  0x17   :  { %356 = shalt.err (!%p353_p9)
}
  0x18   :  { %24 = dma.hbm_to_vmem [thread:$0]  %s475_s0, 128, %s19_s21, [#allocation3], %s405_s23, %s405_s23, %s406_s24  }
  0x19   :  { %s407_s6 = smov [#allocation7]  }
  0x1a   :  { %s44_s7 = sshll.u32 %s407_s6, 4  ;;  %s45_s7 = int_to_ptr.vmem [resolvable:$true] %s44_s7 }
  0x1b   :  { %s365_s8 = scalar_lea.vmem %s45_s7, 512  ;;  %p370_p11 = scmp.lt.s32.totalorder %s45_s7, %s45_s7 }
  0x1c   :  { %p366_p10 = scmp.ne.s32.totalorder %s45_s7, %s365_s8  ;;  %p371_p12 = scmp.lt.s32.totalorder %s365_s8, %s365_s8 }
  0x1e   :  { %p372_p13 = por %p371_p12, %p370_p11 }
  0x20   :  { %p373_p0 = pnand %p372_p13, %p366_p10 }
  0x22   :  { %376 = shalt.err (!%p373_p0)
}
  0x23   :  { %50 = dma.hbm_to_vmem [thread:$0]  %s478_s3, 512, %s45_s7, [#allocation6], %s405_s23, %s405_s23, %s406_s24  }
  0x24   :  { %397 = dma.done.wait [#allocation3], 256  }
  0x25   :  { %398 = vsyncadd [#allocation3], 4294967040 }
  0x26   :  { %399 = dma.done.wait [#allocation6], 1024  }
  0x27   :  { %400 = vsyncadd [#allocation6], 4294966272  ;;  %vm75_vm0 = vcmask 261120   ;;  %v67_v0 = vld [vmem:[#allocation5 + $0x18] sm:$0xff]  ;;  %v66_v1 = vld [vmem:[#allocation5 + $0x10] sm:$0xff] }
  0x28   :  { %289 = vmatprep.subr.mxu0 %v67_v0  ;;  %v62_v2 = vld [vmem:[#allocation2] sm:$0xff]  ;;  %v65_v3 = vld [vmem:[#allocation5 + $0x8] sm:$0xff]  ;;  %v160_v4 = vld [vmem:[#allocation7 + $0x18] sm:$0xff] }
  0x29   :  { %290 = vmatpush3.msra.mxu0 %v67_v0  ;;  %297 = vmatprep.mubr.msk.f32.mxu0 %vm75_vm0, %v62_v2  ;;  %v64_v5 = vld [vmem:[#allocation5] sm:$0xff]  ;;  %v63_v6 = vld [vmem:[#allocation2 + $0x8] sm:$0xff]  ;;  %v159_v7 = vld [vmem:[#allocation7 + $0x10] sm:$0xff] }
  0x2a   :  { %291 = vmatprep.subr.mxu0 %v66_v1  ;;  %300 = vmatprep.subr.mxu1 %v160_v4  ;;  %v158_v8 = vld [vmem:[#allocation7 + $0x8] sm:$0xff]  ;;  %v157_v9 = vld [vmem:[#allocation7] sm:$0xff]  ;;  %v271_v11 = vld [vmem:[%s477_s2] ss:$0 sm:$0xff] }
  0x2b   :  { %292 = vmatpush3.msra.mxu0 %v66_v1  ;;  %301 = vmatpush3.msra.mxu1 %v160_v4  ;;  %v274_v15 = vld [vmem:[%s479_s4] ss:$0 sm:$0xff] }
  0x2c   :  { %293 = vmatprep.subr.mxu0 %v65_v3  ;;  %302 = vmatprep.subr.mxu1 %v159_v7 }
  0x2d   :  { %294 = vmatpush3.msra.mxu0 %v65_v3  ;;  %303 = vmatpush3.msra.mxu1 %v159_v7 }
  0x2e   :  { %295 = vmatprep.subr.mxu0 %v64_v5  ;;  %304 = vmatprep.subr.mxu1 %v158_v8 }
  0x2f   :  { %296 = vmatpush3.msra.mxu0 %v64_v5  ;;  %305 = vmatpush3.msra.mxu1 %v158_v8 }
  0x30   :  { %298 = vmatmul.mubr.msk.f32.vlgmr.msra.gmra.mxu0 %vm75_vm0, %v63_v6  ;;  %306 = vmatprep.subr.mxu1 %v157_v9 }
  0x31   :  { %307 = vmatpush3.msra.mxu1 %v157_v9 }
  0xf0   :  { %v299_v10 = vpop.f32.mrf.mxu0 }
  0xf1   :  { %v154_v14 = vadd.f32 %v299_v10, %v271_v11 }
  0xf2   :  { %v148_v12 = vpop.f32.mrf.mxu0 }
  0xf3   :  { %v149_v13 = vadd.f32 %v271_v11, %v148_v12 }
  0xf5   :  { %308 = vmatprep.mubr.msk.f32.mxu1 %vm75_vm0, %v149_v13 }
  0xf6   :  { %309 = vmatmul.mubr.msk.f32.vlgmr.msra.gmra.mxu1 %vm75_vm0, %v154_v14 }
 0x1b6   :  { %v310_v16 = vpop.f32.mrf.mxu1 }
 0x1b7   :  { %v246_v17 = vadd.f32 %v310_v16, %v274_v15 }
 0x1b8   :  { %v240_v18 = vpop.f32.mrf.mxu1 }
 0x1b9   :  { %v250_v19 = vadd.f32 %v246_v17, %v63_v6  ;;  %v241_v20 = vadd.f32 %v274_v15, %v240_v18 }
 0x1bb   :  { %252 = vst.msk [vmem:[#allocation8 + $0x8] sm:$0xff] %vm75_vm0, %v250_v19  ;;  %v249_v21 = vadd.f32 %v241_v20, %v62_v2 }
 0x1bd   :  { %251 = vst.msk [vmem:[#allocation8] sm:$0xff] %vm75_vm0, %v249_v21 }
 0x1be   :  { %257 = vsyncadd [#allocation4], 128  ;;  %s408_s2 = smov [#allocation8]  }
 0x1bf   :  { %s258_s12 = sshll.u32 %s408_s2, 4  ;;  %s259_s12 = int_to_ptr.vmem [resolvable:$true] %s258_s12 }
 0x1c0   :  { %s377_s13 = scalar_lea.vmem %s259_s12, 128  ;;  %s381_s14 = scalar_lea.vmem %s259_s12, 256 }
 0x1c1   :  { %p378_p1 = scmp.ne.s32.totalorder %s259_s12, %s377_s13  ;;  %p382_p2 = scmp.lt.s32.totalorder %s259_s12, %s259_s12 }
 0x1c2   :  { %p383_p3 = scmp.lt.s32.totalorder %s381_s14, %s377_s13 }
 0x1c4   :  { %p384_p4 = por %p383_p3, %p382_p2 }
 0x1c6   :  { %p385_p5 = pnand %p384_p4, %p378_p1 }
 0x1c8   :  { %388 = shalt.err (!%p385_p5)
}
 0x1c9   :  { %264 = dma.vmem_to_hbm [thread:$0]  %s259_s12, 128, %s480_s5, [#allocation4], %s405_s23, %s405_s23, %s406_s24  }
 0x1ca   :  { %401 = dma.done.wait [#allocation4], 256  }
 0x1cb   :  { %402 = vsyncadd [#allocation4], 4294967040 }
 0x1cc   :  { %268 = vsyncpa [#allocation3], 1 }
 0x1cd   :  { %269 = vsyncpa [#allocation6], 1 }
 0x1ce   :  { %270 = vsyncpa [#allocation4], 1 }

</bundles_post_ra>
